<compile_context>
chip_gen: v6e
topology: v6e:2x2x1
jax: 0.10.0
libtpu: 0.0.40
codegen_flags: <defaults>
</compile_context>

<pallas_src>
import functools

import jax
import jax.numpy as jnp
from jax.experimental import pallas as pl
from jax.experimental.pallas import tpu as pltpu


def _loss_kernel(emb_ref, w_ref, b_ref, lab_ref, out_ref, *,
                 margin, scale, n_valid, t_valid):
    """One row block -> globally-normalized partial loss in its output block."""
    i = pl.program_id(0)
    eps = 1e-6                       # matches torch.pairwise_distance default
    tm = emb_ref.shape[0]            # rows per block; tm % 24 == 0

    # Single DMA'd row tile, upcast once; all later math reuses this load.
    x = emb_ref[...].astype(jnp.float32)                          # (TM, E)

    # --- Triplet margin loss (mean over GLOBAL triplet count) ---------------
    # Shifted views of the loaded tile replace the old stride-3 ref gathers.
    # For an anchor row r (r % 3 == 0): x[r]-x[r+1] = a-p, x[r]-x[r+2] = a-n.
    # Static-shift jnp.roll lowers to two static sublane slices + concat; the
    # wrapped rows land on non-anchor rows and are masked below.
    dp = x - jnp.roll(x, -1, axis=0)                              # row r - row r+1
    dn = x - jnp.roll(x, -2, axis=0)                              # row r - row r+2
    d_ap = jnp.sqrt(jnp.sum((dp + eps) ** 2, axis=-1, keepdims=True))   # (TM, 1)
    d_an = jnp.sqrt(jnp.sum((dn + eps) ** 2, axis=-1, keepdims=True))   # (TM, 1)
    hinge = jnp.maximum(d_ap - d_an + margin, 0.0)                       # (TM, 1)
    row_idx = i * tm + jax.lax.broadcasted_iota(jnp.int32, (tm, 1), 0)
    is_anchor = jnp.logical_and(row_idx % 3 == 0, row_idx < n_valid)
    trip_partial = jnp.sum(jnp.where(is_anchor, hinge, 0.0)) * (1.0 / t_valid)

    # --- Linear head + cross entropy (mean over GLOBAL row count) -----------
    w = w_ref[...].astype(jnp.float32)                            # (E, C) resident
    b = b_ref[...].astype(jnp.float32)                            # (1, C) resident
    logits = jnp.dot(x, w, preferred_element_type=jnp.float32) + b       # (TM, C)
    m = jnp.max(logits, axis=-1, keepdims=True)                          # (TM, 1)
    lse = jnp.log(jnp.sum(jnp.exp(logits - m), axis=-1, keepdims=True)) + m
    labels = lab_ref[...]                                                # (TM, 1)
    col = jax.lax.broadcasted_iota(jnp.int32, logits.shape, 1)
    picked = jnp.sum(jnp.where(col == labels, logits, 0.0),
                     axis=-1, keepdims=True)                             # (TM, 1)
    per_row_ce = jnp.where(row_idx < n_valid, lse - picked, 0.0)
    ce_partial = jnp.sum(per_row_ce) * (1.0 / n_valid)

    # Lane-dense per-block partial; tiny final reduction happens in the wrapper.
    partial = trip_partial + scale * ce_partial
    out_ref[...] = jnp.full(out_ref.shape, partial, dtype=jnp.float32)


def _generation_limits():
    """(vmem_limit_bytes, per-buffer embeddings tile budget) for this chip."""
    cap = 64 * 1024 * 1024                       # conservative default (v7x / TC)
    try:
        c = getattr(pltpu.get_tpu_info(), "vmem_capacity_bytes", None)
        if isinstance(c, int) and c > 0:
            cap = c
    except Exception:
        pass
    if cap >= 100 * 1024 * 1024:                 # v5e / v6e: 128 MiB physical VMEM
        return 100 * 1024 * 1024, 8 * 1024 * 1024
    return 48 * 1024 * 1024, 4 * 1024 * 1024     # v7x: 64 MiB per TensorCore


def _pick_row_tile(n_rows, row_bytes, tile_budget_bytes):
    """Largest multiple-of-24 row tile within the byte budget, >= 2 blocks."""
    tm = max(24, (tile_budget_bytes // max(1, row_bytes)) // 24 * 24)
    tm = min(tm, 24 * pl.cdiv(n_rows, 24))               # never exceed padded batch
    if n_rows > 24:                                      # keep >= 2 blocks (megacore)
        tm = min(tm, max(24, 24 * ((n_rows - 1) // 24)))
    num_blocks = pl.cdiv(n_rows, tm)
    if num_blocks > 1 and num_blocks % 2 == 1:           # prefer even block count
        tm = max(24, 24 * pl.cdiv(pl.cdiv(n_rows, num_blocks + 1), 24))
        num_blocks = pl.cdiv(n_rows, tm)
    return tm, num_blocks


def custom_loss(embeddings, labels, fc_weight, fc_bias, *,
                margin=0.2, scale=30.0,
                tile_budget_bytes=None, vmem_limit_bytes=None):
    """embeddings: (N,E); labels: (N,) int; fc_weight: (C,E); fc_bias: (C,)."""
    N, E = embeddings.shape
    C = fc_weight.shape[0]
    assert N % 3 == 0, "batch must be a multiple of 3 (anchor/positive/negative)"

    gen_vmem, gen_budget = _generation_limits()
    if vmem_limit_bytes is None:
        vmem_limit_bytes = gen_vmem
    if tile_budget_bytes is None:
        tile_budget_bytes = gen_budget

    # Row tile: multiple of 24 (whole triplets, 8-sublane aligned), sized by a
    # VMEM byte budget (memory-bound kernel wants MiB-scale tiles), but split
    # into >= 2 blocks so the "parallel" axis can use both v7x TensorCores.
    row_bytes = embeddings.dtype.itemsize * E
    tm, num_blocks = _pick_row_tile(N, row_bytes, tile_budget_bytes)
    n_pad = num_blocks * tm

    if n_pad != N:  # pad to whole tiles; the kernel masks padded rows
        embeddings = jnp.pad(embeddings, ((0, n_pad - N), (0, 0)))
        labels = jnp.pad(labels, (0, n_pad - N))

    w_ec = fc_weight.T.astype(jnp.float32)       # (E, C): logits = x @ W.T + b
    b_1c = fc_bias.reshape(1, C).astype(jnp.float32)
    labels_2d = labels.reshape(n_pad, 1).astype(jnp.int32)

    kernel = functools.partial(
        _loss_kernel, margin=float(margin), scale=float(scale),
        n_valid=int(N), t_valid=int(N // 3))

    out = pl.pallas_call(
        kernel,
        grid=(num_blocks,),
        out_shape=jax.ShapeDtypeStruct((num_blocks, 8, 128), jnp.float32),
        in_specs=[
            pl.BlockSpec((tm, E), lambda i: (i, 0)),   # embeddings row tile
            pl.BlockSpec((E, C), lambda i: (0, 0)),    # W resident across grid
            pl.BlockSpec((1, C), lambda i: (0, 0)),    # bias resident
            pl.BlockSpec((tm, 1), lambda i: (i, 0)),   # labels row tile
        ],
        # Lane-dense per-block partial output; keep "parallel" (no accumulator)
        # so v7x megacore can shard the row loop across both TensorCores.
        out_specs=pl.BlockSpec((1, 8, 128), lambda i: (i, 0, 0)),
        compiler_params=pltpu.CompilerParams(
            dimension_semantics=("parallel",),
            vmem_limit_bytes=int(vmem_limit_bytes)),
    )(embeddings, w_ec, b_1c, labels_2d)

    # Tiny final reduction over per-block partials (each already /global count).
    return jnp.sum(out[:, 0, 0])


def _reference_loss(embeddings, labels, fc_weight, fc_bias, *, margin=0.2, scale=30.0):
    eps = 1e-6
    a, p, n = embeddings[0::3], embeddings[1::3], embeddings[2::3]
    d_ap = jnp.sqrt(jnp.sum((a - p + eps) ** 2, axis=-1))
    d_an = jnp.sqrt(jnp.sum((a - n + eps) ** 2, axis=-1))
    trip = jnp.mean(jnp.maximum(d_ap - d_an + margin, 0.0))
    logits = embeddings @ fc_weight.T + fc_bias
    lse = jax.scipy.special.logsumexp(logits, axis=-1)
    picked = jnp.take_along_axis(logits, labels[:, None], axis=-1)[:, 0]
    ce = jnp.mean(lse - picked)
    return trip + scale * ce


if __name__ == "__main__":
    # Module hyperparameters (synthetic, deterministic init).
    embedding_size = 32
    num_classes = 8
    margin = 0.2
    scale = 30.0

    N = 60  # 20 triplets; tile picker -> tm=48, 2 blocks, padded rows masked

    key = jax.random.PRNGKey(0)
    k_emb, k_w, k_b, k_lab = jax.random.split(key, 4)
    embeddings = jax.random.normal(k_emb, (N, embedding_size), dtype=jnp.float32)
    labels = jax.random.randint(k_lab, (N,), 0, num_classes, dtype=jnp.int32)
    # nn.Linear-style deterministic init for the (undeclared in __init__) fc head.
    bound = 1.0 / (embedding_size ** 0.5)
    fc_weight = jax.random.uniform(k_w, (num_classes, embedding_size),
                                   minval=-bound, maxval=bound, dtype=jnp.float32)
    fc_bias = jax.random.uniform(k_b, (num_classes,),
                                 minval=-bound, maxval=bound, dtype=jnp.float32)

    loss = custom_loss(embeddings, labels, fc_weight, fc_bias,
                       margin=margin, scale=scale)
    loss = jax.block_until_ready(loss)

    ref = _reference_loss(embeddings, labels, fc_weight, fc_bias,
                          margin=margin, scale=scale)
    assert jnp.allclose(loss, ref, rtol=1e-4, atol=1e-4), (loss, ref)

    print("KERNEL_OK")
</pallas_src>

<mosaic_0001>
module attributes {stable_mosaic.version = 11 : i64} {
  func.func @_loss_kernel(%arg0: i32, %arg1: memref<48x32xf32, #tpu.memory_space<vmem>>, %arg2: memref<32x8xf32, #tpu.memory_space<vmem>>, %arg3: memref<1x8xf32, #tpu.memory_space<vmem>>, %arg4: memref<48x1xi32, #tpu.memory_space<vmem>>, %arg5: memref<1x8x128xf32, #tpu.memory_space<vmem>>) attributes {dimension_semantics = [#tpu.dimension_semantics<parallel>], iteration_bounds = array<i64: 2>, scalar_prefetch = 0 : i64, scratch_operands = 0 : i64, tpu.core_type = #tpu.core_type<tc>, window_params = [{transform_indices = @transform_0, window_bounds = array<i64: 48, 32>}, {pipeline_mode = #tpu.pipeline_mode<synchronous>, transform_indices = @transform_1, window_bounds = array<i64: 32, 8>}, {pipeline_mode = #tpu.pipeline_mode<synchronous>, transform_indices = @transform_2, window_bounds = array<i64: 1, 8>}, {transform_indices = @transform_3, window_bounds = array<i64: 48, 1>}, {transform_indices = @transform_4, window_bounds = array<i64: 1, 8, 128>}]} {
    %c0 = arith.constant 0 : index
    %c0_0 = arith.constant 0 : index
    %0 = vector.load %arg1[%c0, %c0_0] : memref<48x32xf32, #tpu.memory_space<vmem>>, vector<48x32xf32>
    %1 = vector.extract_strided_slice %0 {offsets = [1, 0], sizes = [47, 32], strides = [1, 1]} : vector<48x32xf32> to vector<47x32xf32>
    %2 = vector.extract_strided_slice %0 {offsets = [0, 0], sizes = [1, 32], strides = [1, 1]} : vector<48x32xf32> to vector<1x32xf32>
    %3 = tpu.concatenate %1, %2 in 0 : vector<47x32xf32>, vector<1x32xf32> -> vector<48x32xf32>
    %4 = arith.subf %0, %3 : vector<48x32xf32>
    %5 = vector.extract_strided_slice %0 {offsets = [2, 0], sizes = [46, 32], strides = [1, 1]} : vector<48x32xf32> to vector<46x32xf32>
    %6 = vector.extract_strided_slice %0 {offsets = [0, 0], sizes = [2, 32], strides = [1, 1]} : vector<48x32xf32> to vector<2x32xf32>
    %7 = tpu.concatenate %5, %6 in 0 : vector<46x32xf32>, vector<2x32xf32> -> vector<48x32xf32>
    %8 = arith.subf %0, %7 : vector<48x32xf32>
    %cst = arith.constant 9.99999997E-7 : f32
    %9 = vector.broadcast %cst : f32 to vector<48x32xf32>
    %10 = arith.addf %4, %9 : vector<48x32xf32>
    %11 = arith.mulf %10, %10 : vector<48x32xf32>
    %cst_1 = arith.constant dense<0.000000e+00> : vector<48xf32>
    %12 = vector.multi_reduction <add>, %11, %cst_1 [1] : vector<48x32xf32> to vector<48xf32>
    %13 = vector.shape_cast %12 : vector<48xf32> to vector<48x1xf32>
    %14 = math.sqrt %13 : vector<48x1xf32>
    %cst_2 = arith.constant 9.99999997E-7 : f32
    %15 = vector.broadcast %cst_2 : f32 to vector<48x32xf32>
    %16 = arith.addf %8, %15 : vector<48x32xf32>
    %17 = arith.mulf %16, %16 : vector<48x32xf32>
    %cst_3 = arith.constant dense<0.000000e+00> : vector<48xf32>
    %18 = vector.multi_reduction <add>, %17, %cst_3 [1] : vector<48x32xf32> to vector<48xf32>
    %19 = vector.shape_cast %18 : vector<48xf32> to vector<48x1xf32>
    %20 = math.sqrt %19 : vector<48x1xf32>
    %21 = arith.subf %14, %20 : vector<48x1xf32>
    %cst_4 = arith.constant 2.000000e-01 : f32
    %22 = vector.broadcast %cst_4 : f32 to vector<48x1xf32>
    %23 = arith.addf %21, %22 : vector<48x1xf32>
    %cst_5 = arith.constant 0.000000e+00 : f32
    %24 = vector.broadcast %cst_5 : f32 to vector<48x1xf32>
    %25 = arith.maximumf %23, %24 : vector<48x1xf32>
    %c48_i32 = arith.constant 48 : i32
    %26 = arith.muli %arg0, %c48_i32 : i32
    %27 = tpu.iota {dimensions = array<i32: 0>} : vector<48x1xi32>
    %28 = vector.broadcast %26 : i32 to vector<48x1xi32>
    %29 = arith.addi %28, %27 : vector<48x1xi32>
    %c3_i32 = arith.constant 3 : i32
    %c0_i32 = arith.constant 0 : i32
    %30 = arith.cmpi eq, %c3_i32, %c0_i32 : i32
    %c1_i32 = arith.constant 1 : i32
    %31 = arith.select %30, %c1_i32, %c3_i32 : i32
    %32 = vector.broadcast %31 : i32 to vector<48x1xi32>
    %33 = arith.remsi %29, %32 : vector<48x1xi32>
    %c0_i32_6 = arith.constant 0 : i32
    %34 = vector.broadcast %c0_i32_6 : i32 to vector<48x1xi32>
    %35 = arith.cmpi ne, %33, %34 : vector<48x1xi32>
    %c0_i32_7 = arith.constant 0 : i32
    %36 = vector.broadcast %c0_i32_7 : i32 to vector<48x1xi32>
    %37 = arith.cmpi slt, %33, %36 : vector<48x1xi32>
    %c0_i32_8 = arith.constant 0 : i32
    %38 = arith.cmpi slt, %31, %c0_i32_8 : i32
    %39 = vector.broadcast %38 : i1 to vector<48x1xi1>
    %40 = vector.broadcast %39 : vector<48x1xi1> to vector<48x1xi1>
    %41 = arith.xori %37, %40 : vector<48x1xi1>
    %42 = arith.andi %41, %35 : vector<48x1xi1>
    %43 = vector.broadcast %31 : i32 to vector<48x1xi32>
    %44 = arith.addi %33, %43 : vector<48x1xi32>
    %45 = arith.select %42, %44, %33 : vector<48x1xi1>, vector<48x1xi32>
    %c0_i32_9 = arith.constant 0 : i32
    %46 = vector.broadcast %c0_i32_9 : i32 to vector<48x1xi32>
    %47 = arith.cmpi eq, %45, %46 : vector<48x1xi32>
    %c60_i32 = arith.constant 60 : i32
    %48 = vector.broadcast %c60_i32 : i32 to vector<48x1xi32>
    %49 = arith.cmpi slt, %29, %48 : vector<48x1xi32>
    %50 = arith.andi %47, %49 : vector<48x1xi1>
    %cst_10 = arith.constant 0.000000e+00 : f32
    %51 = vector.broadcast %cst_10 : f32 to vector<48x1xf32>
    %52 = arith.select %50, %25, %51 : vector<48x1xi1>, vector<48x1xf32>
    %53 = vector.shape_cast %52 : vector<48x1xf32> to vector<1x48x1xf32>
    %cst_11 = arith.constant dense<0.000000e+00> : vector<1xf32>
    %54 = vector.multi_reduction <add>, %53, %cst_11 [1, 2] : vector<1x48x1xf32> to vector<1xf32>
    %55 = vector.shape_cast %54 : vector<1xf32> to vector<1x1x1xf32>
    %56 = vector.extract %55[0, 0, 0] : f32 from vector<1x1x1xf32>
    %cst_12 = arith.constant 5.000000e-02 : f32
    %57 = arith.mulf %56, %cst_12 : f32
    %c0_13 = arith.constant 0 : index
    %c0_14 = arith.constant 0 : index
    %58 = vector.load %arg2[%c0_13, %c0_14] : memref<32x8xf32, #tpu.memory_space<vmem>>, vector<32x8xf32>
    %c0_15 = arith.constant 0 : index
    %c0_16 = arith.constant 0 : index
    %59 = vector.load %arg3[%c0_15, %c0_16] : memref<1x8xf32, #tpu.memory_space<vmem>>, vector<1x8xf32>
    %cst_17 = arith.constant dense<0.000000e+00> : vector<48x8xf32>
    %60 = tpu.matmul %0, %58, %cst_17 {dimension_numbers = #tpu.dot_dimension_numbers<[1], [0], [0], [1], [0, 0, 1, 1], [], []>} : vector<48x32xf32>, vector<32x8xf32>, vector<48x8xf32> -> vector<48x8xf32>
    %61 = vector.broadcast %59 : vector<1x8xf32> to vector<48x8xf32>
    %62 = arith.addf %60, %61 : vector<48x8xf32>
    %cst_18 = arith.constant dense<0xFF800000> : vector<48xf32>
    %63 = vector.multi_reduction <maximumf>, %62, %cst_18 [1] : vector<48x8xf32> to vector<48xf32>
    %64 = vector.shape_cast %63 : vector<48xf32> to vector<48x1xf32>
    %65 = vector.broadcast %64 : vector<48x1xf32> to vector<48x8xf32>
    %66 = arith.subf %62, %65 : vector<48x8xf32>
    %67 = math.exp %66 : vector<48x8xf32>
    %cst_19 = arith.constant dense<0.000000e+00> : vector<48xf32>
    %68 = vector.multi_reduction <add>, %67, %cst_19 [1] : vector<48x8xf32> to vector<48xf32>
    %69 = vector.shape_cast %68 : vector<48xf32> to vector<48x1xf32>
    %70 = math.log %69 : vector<48x1xf32>
    %71 = arith.addf %70, %64 : vector<48x1xf32>
    %c0_20 = arith.constant 0 : index
    %c0_21 = arith.constant 0 : index
    %72 = vector.load %arg4[%c0_20, %c0_21] : memref<48x1xi32, #tpu.memory_space<vmem>>, vector<48x1xi32>
    %73 = tpu.iota {dimensions = array<i32: 1>} : vector<48x8xi32>
    %74 = vector.broadcast %72 : vector<48x1xi32> to vector<48x8xi32>
    %75 = arith.cmpi eq, %73, %74 : vector<48x8xi32>
    %cst_22 = arith.constant 0.000000e+00 : f32
    %76 = vector.broadcast %cst_22 : f32 to vector<48x8xf32>
    %77 = arith.select %75, %62, %76 : vector<48x8xi1>, vector<48x8xf32>
    %cst_23 = arith.constant dense<0.000000e+00> : vector<48xf32>
    %78 = vector.multi_reduction <add>, %77, %cst_23 [1] : vector<48x8xf32> to vector<48xf32>
    %79 = vector.shape_cast %78 : vector<48xf32> to vector<48x1xf32>
    %c60_i32_24 = arith.constant 60 : i32
    %80 = vector.broadcast %c60_i32_24 : i32 to vector<48x1xi32>
    %81 = arith.cmpi slt, %29, %80 : vector<48x1xi32>
    %82 = arith.subf %71, %79 : vector<48x1xf32>
    %cst_25 = arith.constant 0.000000e+00 : f32
    %83 = vector.broadcast %cst_25 : f32 to vector<48x1xf32>
    %84 = arith.select %81, %82, %83 : vector<48x1xi1>, vector<48x1xf32>
    %85 = vector.shape_cast %84 : vector<48x1xf32> to vector<1x48x1xf32>
    %cst_26 = arith.constant dense<0.000000e+00> : vector<1xf32>
    %86 = vector.multi_reduction <add>, %85, %cst_26 [1, 2] : vector<1x48x1xf32> to vector<1xf32>
    %87 = vector.shape_cast %86 : vector<1xf32> to vector<1x1x1xf32>
    %88 = vector.extract %87[0, 0, 0] : f32 from vector<1x1x1xf32>
    %cst_27 = arith.constant 0.0166666675 : f32
    %89 = arith.mulf %88, %cst_27 : f32
    %cst_28 = arith.constant 3.000000e+01 : f32
    %90 = arith.mulf %cst_28, %89 : f32
    %91 = arith.addf %57, %90 : f32
    %92 = vector.broadcast %91 : f32 to vector<1x8x128xf32>
    %c0_29 = arith.constant 0 : index
    %c0_30 = arith.constant 0 : index
    %c0_31 = arith.constant 0 : index
    %93 = vector.load %arg5[%c0_29, %c0_30, %c0_31] : memref<1x8x128xf32, #tpu.memory_space<vmem>>, vector<1x8x128xf32>
    tpu.vector_store %arg5[%c0_29, %c0_30, %c0_31], %92 {strides = array<i32>} : memref<1x8x128xf32, #tpu.memory_space<vmem>>, vector<1x8x128xf32>,
    return
  }
  func.func @transform_0(%arg0: i32) -> (i32, i32) {
    %c0_i32 = arith.constant 0 : i32
    %c0_i32_0 = arith.constant 0 : i32
    return %arg0, %c0_i32 : i32, i32
  }
  func.func @transform_1(%arg0: i32) -> (i32, i32) {
    %c0_i32 = arith.constant 0 : i32
    %c0_i32_0 = arith.constant 0 : i32
    %c0_i32_1 = arith.constant 0 : i32
    return %c0_i32, %c0_i32_0 : i32, i32
  }
  func.func @transform_2(%arg0: i32) -> (i32, i32) {
    %c0_i32 = arith.constant 0 : i32
    %c0_i32_0 = arith.constant 0 : i32
    %c0_i32_1 = arith.constant 0 : i32
    return %c0_i32, %c0_i32_0 : i32, i32
  }
  func.func @transform_3(%arg0: i32) -> (i32, i32) {
    %c0_i32 = arith.constant 0 : i32
    %c0_i32_0 = arith.constant 0 : i32
    return %arg0, %c0_i32 : i32, i32
  }
  func.func @transform_4(%arg0: i32) -> (i32, i32, i32) {
    %c0_i32 = arith.constant 0 : i32
    %c0_i32_0 = arith.constant 0 : i32
    %c0_i32_1 = arith.constant 0 : i32
    return %arg0, %c0_i32, %c0_i32_0 : i32, i32, i32
  }
}

</mosaic_0001>

<bundles_post_ra>
// kernel: tpu_custom_call.1
= control target key start
LH: loop header
LB: loop body
LE: loop exit
PB: predicated region body
PF: predicated region fallthrough
CT: control target
= control target key end

     0   :  { %9 = vsyncpa [#allocation3], 0  ;;  %s1840_s0 = inlined_call_operand.vmem [shape: f32[96,32], index: 0, kind: input, shape index: {}]   ;;  %s1841_s1 = inlined_call_operand.vmem [shape: f32[32,8], index: 1, kind: input, shape index: {}]   ;;  %s1842_s2 = inlined_call_operand.vmem [shape: f32[1,8], index: 2, kind: input, shape index: {}]   ;;  %s1843_s3 = inlined_call_operand.vmem [shape: s32[96,1], index: 3, kind: input, shape index: {}]   ;;  %s1844_s4 = inlined_call_operand.hbm [shape: f32[2,8,128], index: 4, kind: output, shape index: {}]  }
   0x1   :  { %11 = vsyncpa [#allocation3 + $0x1], 0  ;;  %s1227_s15 = smov 0   ;;  %s1229_s16 = smov 0  }
   0x2   :  { %s1231_s17 = smov 0   ;;  %s1233_s18 = smov 0  }
   0x3 LB: > { %s1248_s19 = sadd.s32 4294967295, %s1198_s18   ;;  %s973_s20 = sadd.s32 4294967294, %s1198_s18   ;;  %s1198_s18 = sphi %s1233_s18, %s1895_s18   ;;  %s1194_s17 = sphi %s1231_s17, %s1894_s17   ;;  %s1190_s16 = sphi %s1229_s16, %s1893_s16   ;;  %s1186_s15 = sphi %s1227_s15, %s1892_s15  }
   0x4   : > { %s1252_s21 = sadd.s32 1, %s1198_s18   ;;  %s118_s22 = sadd.s32 1, %s1194_s17 }
   0x5   : > { %s115_s23 = ssub.s32 %s1198_s18, %s1252_s21  ;;  %p128_p0 = scmp.ne.s32.totalorder %s1194_s17, %s1190_s16 }
   0x6   : > { %p116_p1 = scmp.eq.s32.totalorder %s115_s23, 0  ;;  %p129_p2 = scmp.eq.s32.totalorder %s1248_s19, 1 }
   0x7   : > { %p134_p3 = scmp.ne.s32.totalorder %s1190_s16, %s1186_s15  ;;  %p135_p4 = scmp.eq.s32.totalorder %s973_s20, 1 }
   0x8   : > { %s1263_s24 = scalar_select %p116_p1, %s1194_s17, %s118_s22  }
   0x9   : > { %p1265_p5 = por %p129_p2, %p128_p0  ;;  %p1269_p6 = por %p135_p4, %p134_p3 }
   0xa   : > { %p976_p7 = scmp.ge.s32.totalorder %s1198_s18, 1  ;;  %p177_p8 = scmp.lt.s32.totalorder %s1198_s18, 3 }
   0xc   : > { %p178_p9 = pnand %p976_p7, %p177_p8 }
   0xd   : > { %s208_s5 = smul.u32 (!%p178_p9), 6, %s1248_s19  ;;  %s205_s29 = sand.u32 (!%p178_p9), 1, %s1190_s16  }
   0xe   : > { %181 = sbr.rel (%p178_p9) target bundleno = 778 (0x30a), region = 36  ;;  %s977_s30 = sshll.u32 (!%p178_p9), %s205_s29, 3 }
   0xf   : > { %p209_p10 = scmp.lt.s32.totalorder (!%p178_p9), %s208_s5, 11  ;;  %s447_s28 = smul.u32 (!%p178_p9), 48, %s1248_s19 }
  0x10   : > { %s994_s9 = sshll.u32 (!%p178_p9), %s1248_s19, 7  ;;  %s207_s11 = scalar_lea.vmem (!%p178_p9), [#allocation2], %s977_s30 }
  0x11   : > { %s902_s12 = sshll.u32 (!%p178_p9), %s207_s11, 4  ;;  %s1805_s22 = scalar_lea.hbm (!%p178_p9), %s1844_s4, %s994_s9  ;;  %s903_s12 = int_to_ptr.vmem [resolvable:$true] %s902_s12 }
  0x12   : > { %s889_s23 = scalar_lea.sflag (!%p178_p9), [#allocation3], %s205_s29 }
  0x13   : > { %v607_v0 = vld [vmem:[%s1841_s1 + $0x18] sm:$0xff]  ;;  %v606_v1 = vld [vmem:[%s1841_s1 + $0x10] sm:$0xff]  ;;  %v605_v2 = vld [vmem:[%s1841_s1 + $0x8] sm:$0xff]  ;;  %s1897_s5 = smov (!%p209_p10, %s208_s5), 11  ;;  %vm296_vm0 = vcmask 261120   ;;  %v1200_v10 = vmov 0  }
  0x14   : > { %1007 = vmatprep.subr.mxu0 %v607_v0  ;;  %1024 = vmatprep.subr.mxu1 %v607_v0  ;;  %v604_v3 = vld [vmem:[%s1841_s1] sm:$0xff]  ;;  %s978_s10 = sshll.u32 %s1897_s5, 3  ;;  %vm722_vm1 = vcmask 64512   ;;  %vm232_vm2 = vcmask 1046528   ;;  %vm258_vm3 = vcmask 1045504  }
  0x15   : > { %1008 = vmatpush3.msra.mxu0 %v607_v0  ;;  %1028 = vmatpush3.msra.mxu1 %v607_v0  ;;  %s212_s13 = scalar_lea.vmem %s1840_s0, %s978_s10  ;;  %v986_v11 = vld [vmem:[%s1842_s2] ss:$0 sm:$0xff]  ;;  %s218_s27 = scalar_lea.vmem %s1843_s3, %s978_s10 }
  0x16   : > { %1009 = vmatprep.subr.mxu0 %v606_v1  ;;  %1025 = vmatprep.subr.mxu1 %v606_v1  ;;  %v1296_v4 = vld [vmem:[%s212_s13] sm:$0xff]  ;;  %v1298_v5 = vld [vmem:[%s212_s13 + $0x10] sm:$0xff]  ;;  %v1300_v6 = vld [vmem:[%s212_s13 + $0x8] sm:$0xff] }
  0x17   : > { %1010 = vmatpush3.msra.mxu0 %v606_v1  ;;  %1029 = vmatpush3.msra.mxu1 %v606_v1  ;;  %v1306_v7 = vld [vmem:[%s212_s13 + $0x18] sm:$0xff]  ;;  %v1308_v8 = vld [vmem:[%s212_s13 + $0x20] sm:$0xff]  ;;  %v1316_v9 = vld [vmem:[%s212_s13 + $0x28] sm:$0xff]  ;;  %v236_v36 = vrot.slane %v1298_v5, 1  ;;  %v234_v37 = vrot.slane %v1300_v6, 1  ;;  %v233_v47 = vrot.slane %v1296_v4, 1 }
  0x18   : > { %1011 = vmatprep.subr.mxu0 %v605_v2  ;;  %1026 = vmatprep.subr.mxu1 %v605_v2  ;;  %v796_v30 = vld [vmem:[%s218_s27 + $0x8] sm:$0xff]  ;;  %v797_v31 = vld [vmem:[%s218_s27 + $0x10] sm:$0xff]  ;;  %v795_v32 = vld [vmem:[%s218_s27] sm:$0xff]  ;;  %v238_v39 = vrot.slane %v1306_v7, 1  ;;  %v240_v42 = vrot.slane %v1308_v8, 1  ;;  %v242_v46 = vrot.slane %v1316_v9, 1 }
  0x19   : > { %1012 = vmatpush3.msra.mxu0 %v605_v2  ;;  %1030 = vmatpush3.msra.mxu1 %v605_v2  ;;  %v798_v33 = vld [vmem:[%s218_s27 + $0x18] sm:$0xff]  ;;  %v799_v34 = vld [vmem:[%s218_s27 + $0x20] sm:$0xff]  ;;  %v800_v35 = vld [vmem:[%s218_s27 + $0x28] sm:$0xff]  ;;  %v237_v38 = vsel %vm232_vm2, %v234_v37, %v236_v36  ;;  %v235_v52 = vsel %vm232_vm2, %v233_v47, %v234_v37  ;;  %v259_v53 = vrot.slane %v1296_v4, 2  ;;  %v268_v54 = vrot.slane %v1316_v9, 2  ;;  %s1138_s27 = scalar_lea.vmem %s903_s12, 128 }
  0x1a   : > { %1013 = vmatprep.subr.mxu0 %v604_v3  ;;  %1027 = vmatprep.subr.mxu1 %v604_v3  ;;  %v253_v40 = vsub.f32 %v1300_v6, %v237_v38  ;;  %v239_v41 = vsel %vm232_vm2, %v236_v36, %v238_v39  ;;  %v241_v45 = vsel %vm232_vm2, %v238_v39, %v240_v42  ;;  %v260_v59 = vrot.slane %v1300_v6, 2  ;;  %p1139_p11 = scmp.ne.s32.totalorder %s903_s12, %s1138_s27 }
  0x1b   : > { %1014 = vmatpush3.msra.mxu0 %v604_v3  ;;  %1031 = vmatpush3.msra.mxu1 %v604_v3  ;;  %v254_v44 = vsub.f32 %v1298_v5, %v239_v41  ;;  %v255_v50 = vsub.f32 %v1306_v7, %v241_v45  ;;  %v243_v51 = vsel %vm232_vm2, %v240_v42, %v242_v46  ;;  %v262_v3 = vrot.slane %v1298_v5, 2 }
  0x1c   : > { %1015 = vmatprep.mubr.msk.f32.mxu0 %vm296_vm0, %v1296_v4  ;;  %1018 = vmatprep.mubr.msk.f32.mxu1 %vm296_vm0, %v1298_v5  ;;  %v285_v43 = vadd.f32 1e-06, %v253_v40  ;;  %v256_v58 = vsub.f32 %v1308_v8, %v243_v51  ;;  %v277_v60 = vsel %vm258_vm3, %v268_v54, %v259_v53  ;;  %v252_v61 = vsub.f32 %v1296_v4, %v235_v52  ;;  %p1140_p12 = pnand %p1139_p11, %p1265_p5 }
  0x1d   : > { %1016 = vmatmul.mubr.msk.f32.vlgmr.msra.gmra.mxu0 %vm296_vm0, %v1300_v6  ;;  %1019 = vmatmul.mubr.msk.f32.vlgmr.msra.gmra.mxu1 %vm296_vm0, %v1306_v7  ;;  %v286_v49 = vadd.f32 1e-06, %v254_v44  ;;  %v287_v57 = vadd.f32 1e-06, %v255_v50  ;;  %v283_v1 = vsub.f32 %v1316_v9, %v277_v60  ;;  %v261_v2 = vsel %vm258_vm3, %v259_v53, %v260_v59 }
  0x1e   : > { %1021 = vmatprep.mubr.msk.f32.mxu1 %vm296_vm0, %v1308_v8  ;;  %1089 = vset.pattern.permute.xlu1 %v1200_v10  ;;  %v291_v48 = vmul.f32 %v285_v43, %v285_v43  ;;  %v288_v0 = vadd.f32 1e-06, %v256_v58  ;;  %v251_v42 = vsel %vm232_vm2, %v242_v46, %v233_v47  ;;  %p1141_p13 = pneg %p1140_p12 }
  0x1f   : > { %1088 = vset.pattern.permute.xlu0 %v1200_v10  ;;  %v292_v56 = vmul.f32 %v286_v49, %v286_v49  ;;  %v293_v63 = vmul.f32 %v287_v57, %v287_v57  ;;  %v284_v10 = vadd.f32 1e-06, %v252_v61 }
  0x20   : > { %v300_v55 = vsel %vm296_vm0, %v291_v48, 0.0  ;;  %v257_v48 = vsub.f32 %v1316_v9, %v251_v42 }
  0x21   : > { %1022 = vmatmul.mubr.msk.f32.gmra.mxu1 %vm296_vm0, %v1316_v9  ;;  %v303_v62 = vsel %vm296_vm0, %v292_v56, 0.0 }
  0x22   : > { %v289_v50 = vadd.f32 1e-06, %v257_v48 }
  0x24   : > { %v295_v52 = vmul.f32 %v289_v50, %v289_v50 }
  0xdd   : > { %v1017_v12 = vpop.f32.mrf.mxu0  ;;  %v1020_v13 = vpop.f32.mrf.mxu1 }
  0xde   : > { %v1323_v14 = vadd.f32 %v1017_v12, %v986_v11  ;;  %v1325_v15 = vadd.f32 %v1020_v13, %v986_v11  ;;  %v306_v12 = vsel %vm296_vm0, %v293_v63, 0.0  ;;  %v294_v13 = vmul.f32 %v288_v0, %v288_v0 }
  0xdf   : > { %v693_v16 = vpop.f32.mrf.mxu0  ;;  %v703_v17 = vpop.f32.mrf.mxu1 }
  0xe0   : > { %v1327_v18 = vadd.f32 %v986_v11, %v693_v16  ;;  %v732_v19 = vsel %vm722_vm1, %v1325_v15, -inf  ;;  %v1331_v20 = vadd.f32 %v986_v11, %v703_v17  ;;  %v726_v21 = vsel %vm722_vm1, %v1323_v14, -inf }
  0xe1   : > { %733 = vmax.xlane.f32.xlu1 %v732_v19  ;;  %727 = vmax.xlane.f32.xlu0 %v726_v21  ;;  %v1023_v22 = vpop.f32.mrf.mxu1  ;;  %v362_v16 = vadd.f32 1e-06, %v283_v1  ;;  %v263_v17 = vsel %vm258_vm3, %v260_v59, %v262_v3  ;;  %v264_v19 = vrot.slane %v1306_v7, 2  ;;  %v290_v21 = vmul.f32 %v284_v10, %v284_v10 }
  0xe2   : > { %v1335_v23 = vadd.f32 %v1023_v22, %v986_v11  ;;  %v729_v24 = vsel %vm722_vm1, %v1331_v20, -inf  ;;  %v723_v27 = vsel %vm722_vm1, %v1327_v18, -inf }
  0xe3   : > { %v713_v25 = vpop.f32.mrf.mxu1 }
  0xe4   : > { %v1339_v26 = vadd.f32 %v986_v11, %v713_v25  ;;  %v738_v28 = vsel %vm722_vm1, %v1335_v23, -inf  ;;  %v278_v11 = vsub.f32 %v1296_v4, %v261_v2  ;;  %v309_v25 = vsel %vm296_vm0, %v294_v13, 0.0 }
  0xe5   : > { %730 = vmax.xlane.f32.xlu1 %v729_v24  ;;  %724 = vmax.xlane.f32.xlu0 %v723_v27  ;;  %v279_v24 = vsub.f32 %v1300_v6, %v263_v17  ;;  %v368_v27 = vmul.f32 %v362_v16, %v362_v16  ;;  %v266_v4 = vrot.slane %v1308_v8, 2 }
  0xe6   : > { %v735_v29 = vsel %vm722_vm1, %v1339_v26, -inf  ;;  %v357_v22 = vadd.f32 1e-06, %v278_v11 }
  0xe7   : > { %v269_v38 = vsel %vm258_vm3, %v266_v4, %v268_v54 }
  0xe9   : > { %739 = vmax.xlane.f32.xlu1 %v738_v28  ;;  %736 = vmax.xlane.f32.xlu0 %v735_v29  ;;  %v265_v28 = vsel %vm258_vm3, %v262_v3, %v264_v19  ;;  %v297_v29 = vsel %vm296_vm0, %v290_v21, 0.0 }
  0xfa   : > { %807 = vperm.xlu1 %1089, %v796_v30   ;;  %v363_v30 = vmul.f32 %v357_v22, %v357_v22 }
  0xfc   : > { %v369_v6 = vsel %vm296_vm0, %v363_v30, 0.0 }
  0xfe   : > { %810 = vperm.xlu1 %1089, %v797_v31   ;;  %v358_v31 = vadd.f32 1e-06, %v279_v24 }
  0xff   : > { %804 = vperm.xlu0 %1088, %v795_v32   ;;  %v280_v32 = vsub.f32 %v1298_v5, %v265_v28  ;;  %v282_v5 = vsub.f32 %v1308_v8, %v269_v38  ;;  %v312_v8 = vsel %vm296_vm0, %v295_v52, 0.0 }
 0x101   : > { %v359_v36 = vadd.f32 1e-06, %v280_v32  ;;  %v361_v45 = vadd.f32 1e-06, %v282_v5 }
 0x102   : > { %813 = vperm.xlu1 %1089, %v798_v33   ;;  %v384_v33 = vsel %vm296_vm0, %v368_v27, 0.0 }
 0x103   : > { %v365_v40 = vmul.f32 %v359_v36, %v359_v36  ;;  %v367_v49 = vmul.f32 %v361_v45, %v361_v45 }
 0x105   : > { %v375_v43 = vsel %vm296_vm0, %v365_v40, 0.0  ;;  %v381_v51 = vsel %vm296_vm0, %v367_v49, 0.0 }
 0x106   : > { %816 = vperm.xlu1 %1089, %v799_v34   ;;  %v267_v34 = vsel %vm258_vm3, %v264_v19, %v266_v4 }
 0x107   : > { %v281_v37 = vsub.f32 %v1306_v7, %v267_v34 }
 0x109   : > { %v360_v41 = vadd.f32 1e-06, %v281_v37 }
 0x10a   : > { %819 = vperm.xlu1 %1089, %v800_v35   ;;  %v364_v35 = vmul.f32 %v358_v31, %v358_v31 }
 0x10b   : > { %v366_v44 = vmul.f32 %v360_v41, %v360_v41 }
 0x10c   : > { %v372_v39 = vsel %vm296_vm0, %v364_v35, 0.0 }
 0x10d   : > { %v378_v7 = vsel %vm296_vm0, %v366_v44, 0.0 }
 0x11e   : > { %301 = vadd.xlane.f32.xlu0 %v300_v55 }
 0x122   : > { %304 = vadd.xlane.f32.xlu0 %v303_v62 }
 0x126   : > { %307 = vadd.xlane.f32.xlu0 %v306_v12  ;;  %v448_v12 = vlaneseq }
 0x128   : > { %v802_v21 = vand.u32 127, %v448_v12 }
 0x12a   : > { %310 = vadd.xlane.f32.xlu0 %v309_v25 }
 0x12e   : > { %298 = vadd.xlane.f32.xlu1 %v297_v29  ;;  %385 = vadd.xlane.f32.xlu0 %v384_v33 }
 0x132   : > { %370 = vadd.xlane.f32.xlu1 %v369_v6 }
 0x136   : > { %373 = vadd.xlane.f32.xlu1 %v372_v39  ;;  %v449_v39 = vshrl.u32 %v448_v12, 7 }
 0x138   : > { %v450_v42 = vadd.s32 8, %v449_v39  ;;  %v451_v44 = vadd.s32 16, %v449_v39  ;;  %v452_v45 = vadd.s32 24, %v449_v39  ;;  %v454_v50 = vadd.s32 40, %v449_v39 }
 0x13a   : > { %376 = vadd.xlane.f32.xlu1 %v375_v43  ;;  %v455_v43 = vstv %s447_s28  ;;  %s1201_s28 = smov [#allocation2]  }
 0x13b   : > { %v1447_v49 = vadd.s32 %v455_v43, %v451_v44  ;;  %s1142_s19 = sshll.u32 %s1201_s28, 4  ;;  %s1143_s19 = int_to_ptr.vmem [resolvable:$false] %s1142_s19 }
 0x13c   : > { %s1144_s30 = scalar_lea.vmem %s1143_s19, 256  ;;  %p1145_p0 = scmp.lt.s32.totalorder %s903_s12, %s1143_s19 }
 0x13d   : > { %vm484_vm12 = vcmp.lt.s32.totalorder %v1447_v49, 0  ;;  %p1146_p1 = scmp.lt.s32.totalorder %s1144_s30, %s1138_s27 }
 0x13e   : > { %379 = vadd.xlane.f32.xlu1 %v378_v7  ;;  %v453_v7 = vadd.s32 32, %v449_v39 }
 0x13f   : > { %p1147_p2 = por %p1146_p1, %p1145_p0 }
 0x140   : > { %v1451_v52 = vadd.s32 %v455_v43, %v453_v7 }
 0x141   : > { %p1148_p3 = pnand %p1147_p2, %p1141_p13 }
 0x142   : > { %382 = vadd.xlane.f32.xlu1 %v381_v51  ;;  %v1449_v51 = vadd.s32 %v455_v43, %v452_v45  ;;  %vm506_vm14 = vcmp.lt.s32.totalorder %v1451_v52, 0 }
 0x144   : > { %vm495_vm13 = vcmp.lt.s32.totalorder %v1449_v51, 0 }
 0x146   : > { %313 = vadd.xlane.f32.xlu1 %v312_v8 }
 0x16a   : > { %v1400_v46 = vpop.xlane.xlu1 %733  ;;  %v1402_v47 = vpop.xlane.xlu0 %727 }
 0x16b   : > { %v744_v9 = vsub.f32 %v1325_v15, %v1400_v46  ;;  %v742_v53 = vsub.f32 %v1323_v14, %v1402_v47 }
 0x16d   : > { %v749_v54 = vmul.f32 1.442695, %v742_v53  ;;  %v753_v55 = vmul.f32 1.442695, %v744_v9  ;;  %v485_v9 = vsub.s32 0, %v1447_v49  ;;  %v1456_v53 = vadd.s32 %v455_v43, %v454_v50 }
 0x16e   : > { %v1408_v56 = vpop.xlane.xlu1 %730  ;;  %v1410_v57 = vpop.xlane.xlu0 %724 }
 0x16f   : > { %v743_v58 = vsub.f32 %v1331_v20, %v1408_v56  ;;  %v741_v59 = vsub.f32 %v1327_v18, %v1410_v57  ;;  %1090 = vpow2.f32 %v749_v54  ;;  %v496_v54 = vsub.s32 0, %v1449_v51 }
 0x170   : > { %1092 = vpow2.f32 %v753_v55 }
 0x171   : > { %v747_v60 = vmul.f32 1.442695, %v741_v59  ;;  %v751_v61 = vmul.f32 1.442695, %v743_v58  ;;  %v507_v58 = vsub.s32 0, %v1451_v52 }
 0x172   : > { %v1416_v62 = vpop.xlane.xlu1 %739  ;;  %v1418_v63 = vpop.xlane.xlu0 %736 }
 0x173   : > { %v746_v0 = vsub.f32 %v1335_v23, %v1416_v62  ;;  %v745_v1 = vsub.f32 %v1339_v26, %v1418_v63  ;;  %1094 = vpow2.f32 %v747_v60  ;;  %v982_v60 = vmin.u32 %v485_v9, %v1447_v49 }
 0x174   : > { %1096 = vpow2.f32 %v751_v61  ;;  %v983_v61 = vmin.u32 %v496_v54, %v1449_v51 }
 0x175   : > { %v757_v2 = vmul.f32 1.442695, %v746_v0  ;;  %v755_v3 = vmul.f32 1.442695, %v745_v1  ;;  %v518_v0 = vsub.s32 0, %v1456_v53 }
 0x176   : > { %v808_v10 = vpop.permute.xlu1 %807 }
 0x177   : > { %1098 = vpow2.f32 %v757_v2  ;;  %vm822_vm4 = vcmp.eq.s32.totalorder %v802_v21, %v808_v10 }
 0x178   : > { %1100 = vpow2.f32 %v755_v3  ;;  %v828_v33 = vsel %vm822_vm4, %v1323_v14, 0.0  ;;  %v984_v3 = vmin.u32 %v507_v58, %v1451_v52 }
 0x179   : > { %v836_v35 = vsel %vm722_vm1, %v828_v33, 0.0 }
 0x17a   : > { %v811_v11 = vpop.permute.xlu1 %810  ;;  %v805_v29 = vpop.permute.xlu0 %804 }
 0x17b   : > { %vm821_vm5 = vcmp.eq.s32.totalorder %v802_v21, %v805_v29  ;;  %vm823_vm7 = vcmp.eq.s32.totalorder %v802_v21, %v811_v11 }
 0x17c   : > { %v1091_v13 = vpop.eup %1090  ;;  %v827_v36 = vsel %vm821_vm5, %v1327_v18, 0.0  ;;  %v829_v40 = vsel %vm823_vm7, %v1331_v20, 0.0  ;;  %v1443_v20 = vadd.s32 %v455_v43, %v449_v39 }
 0x17d   : > { %v762_v17 = vsel %vm722_vm1, %v1091_v13, 0.0  ;;  %v1093_v19 = vpop.eup %1092  ;;  %v833_v38 = vsel %vm722_vm1, %v827_v36, 0.0  ;;  %v839_v5 = vsel %vm722_vm1, %v829_v40, 0.0 }
 0x17e   : > { %v814_v16 = vpop.permute.xlu1 %813  ;;  %763 = vadd.xlane.f32.xlu1 %v762_v17  ;;  %v768_v25 = vsel %vm722_vm1, %v1093_v19, 0.0  ;;  %v1472_v12 = vmul.u32.u64.low 2863311531, %v982_v60  ;;  %v1473_v13 = vmul.u32.u64.high 2863311531, %v982_v60, %v1472_v12  ;;  %v985_v19 = vmin.u32 %v518_v0, %v1456_v53 }
 0x17f   : > { %vm824_vm6 = vcmp.eq.s32.totalorder %v802_v21, %v814_v16  ;;  %v1475_v16 = vmul.u32.u64.low 2863311531, %v983_v61  ;;  %v1476_v17 = vmul.u32.u64.high 2863311531, %v983_v61, %v1475_v16  ;;  %vm462_vm10 = vcmp.lt.s32.totalorder %v1443_v20, 0 }
 0x180   : > { %v1095_v22 = vpop.eup %1094  ;;  %v830_v37 = vsel %vm824_vm6, %v1325_v15, 0.0  ;;  %v490_v29 = vshrl.u32 %v1473_v13, 1 }
 0x181   : > { %v759_v24 = vsel %vm722_vm1, %v1095_v22, 0.0  ;;  %v1097_v27 = vpop.eup %1096  ;;  %v842_v14 = vsel %vm722_vm1, %v830_v37, 0.0 }
 0x182   : > { %v817_v28 = vpop.permute.xlu1 %816  ;;  %760 = vadd.xlane.f32.xlu0 %v759_v24  ;;  %769 = vadd.xlane.f32.xlu1 %v768_v25  ;;  %v765_v31 = vsel %vm722_vm1, %v1097_v27, 0.0  ;;  %v1482_v24 = vmul.u32.u64.low 2863311531, %v985_v19  ;;  %v1483_v25 = vmul.u32.u64.high 2863311531, %v985_v19, %v1482_v24 }
 0x183   : > { %vm825_vm9 = vcmp.eq.s32.totalorder %v802_v21, %v817_v28 }
 0x184   : > { %v1099_v4 = vpop.eup %1098  ;;  %v831_v15 = vsel %vm825_vm9, %v1339_v26, 0.0  ;;  %v463_v26 = vsub.s32 0, %v1443_v20 }
 0x185   : > { %v774_v30 = vsel %vm722_vm1, %v1099_v4, 0.0  ;;  %v1101_v32 = vpop.eup %1100  ;;  %v845_v48 = vsel %vm722_vm1, %v831_v15, 0.0 }
 0x186   : > { %766 = vadd.xlane.f32.xlu0 %v765_v31  ;;  %775 = vadd.xlane.f32.xlu1 %v774_v30  ;;  %v820_v34 = vpop.permute.xlu1 %819  ;;  %v771_v6 = vsel %vm722_vm1, %v1101_v32, 0.0  ;;  %v980_v55 = vmin.u32 %v463_v26, %v1443_v20  ;;  %v501_v30 = vshrl.u32 %v1476_v17, 1 }
 0x187   : > { %vm826_vm8 = vcmp.eq.s32.totalorder %v802_v21, %v820_v34  ;;  %v1479_v21 = vmul.u32.u64.low 2863311531, %v984_v3  ;;  %v1480_v22 = vmul.u32.u64.high 2863311531, %v984_v3, %v1479_v21  ;;  %v491_v34 = vmul.u32 3, %v490_v29 }
 0x188   : > { %v832_v41 = vsel %vm826_vm8, %v1335_v23, 0.0  ;;  %v1445_v23 = vadd.s32 %v455_v43, %v450_v42  ;;  %v1465_v1 = vmul.u32.u64.low 2863311531, %v980_v55  ;;  %v1466_v2 = vmul.u32.u64.high 2863311531, %v980_v55, %v1465_v1 }
 0x189   : > { %v848_v18 = vsel %vm722_vm1, %v832_v41, 0.0  ;;  %v512_v32 = vshrl.u32 %v1480_v22, 1  ;;  %v492_v39 = vsub.s32 %v982_v60, %v491_v34  ;;  %vm517_vm1 = vcmp.lt.s32.totalorder %v1456_v53, 0 }
 0x18a   : > { %772 = vadd.xlane.f32.xlu0 %v771_v6  ;;  %837 = vadd.xlane.f32.xlu1 %v836_v35  ;;  %v474_v8 = vsub.s32 0, %v1445_v23  ;;  %v468_v27 = vshrl.u32 %v1466_v2, 1  ;;  %v502_v6 = vmul.u32 3, %v501_v30  ;;  %v523_v35 = vshrl.u32 %v1483_v25, 1 }
 0x18b   : > { %vm473_vm11 = vcmp.lt.s32.totalorder %v1445_v23, 0  ;;  %v493_v44 = vsub.s32 0, %v492_v39 }
 0x18c   : > { %v981_v59 = vmin.u32 %v474_v8, %v1445_v23  ;;  %v469_v31 = vmul.u32 3, %v468_v27  ;;  %v503_v40 = vsub.s32 %v983_v61, %v502_v6  ;;  %v524_v41 = vmul.u32 3, %v523_v35 }
 0x18d   : > { %v1514_v9 = vsel %vm484_vm12, %v493_v44, %v492_v39 }
 0x18e   : > { %834 = vadd.xlane.f32.xlu0 %v833_v38  ;;  %843 = vadd.xlane.f32.xlu1 %v842_v14  ;;  %v1469_v10 = vmul.u32.u64.low 2863311531, %v981_v59  ;;  %v1470_v11 = vmul.u32.u64.high 2863311531, %v981_v59, %v1469_v10  ;;  %v470_v37 = vsub.s32 %v980_v55, %v469_v31  ;;  %v513_v38 = vmul.u32 3, %v512_v32 }
 0x18f   : > { %v504_v45 = vsub.s32 0, %v503_v40  ;;  %vm530_vm4 = vcmp.ne.s32.totalorder %v1514_v9, 0  ;;  %vm536_vm5 = vcmp.lt.s32.totalorder %v1514_v9, 0 }
 0x190   : > { %v479_v28 = vshrl.u32 %v1470_v11, 1  ;;  %vm1548_vm12 = vmand %vm536_vm5, %vm530_vm4  ;;  %v548_v11 = vadd.s32 3, %v1514_v9 }
 0x191   : > { %v1516_v54 = vsel %vm495_vm13, %v504_v45, %v503_v40 }
 0x192   : > { %840 = vadd.xlane.f32.xlu0 %v839_v5  ;;  %849 = vadd.xlane.f32.xlu1 %v848_v18  ;;  %v480_v33 = vmul.u32 3, %v479_v28  ;;  %v471_v5 = vsub.s32 0, %v470_v37  ;;  %v514_v18 = vsub.s32 %v984_v3, %v513_v38  ;;  %vm531_vm6 = vcmp.ne.s32.totalorder %v1516_v54, 0 }
 0x193   : > { %vm537_vm7 = vcmp.lt.s32.totalorder %v1516_v54, 0  ;;  %v1562_v16 = vadd.s32 3, %v1516_v54  ;;  %v554_v30 = vsel %vm1548_vm12, %v548_v11, %v1514_v9 }
 0x194   : > { %v481_v14 = vsub.s32 %v981_v59, %v480_v33  ;;  %v1504_v7 = vsel %vm462_vm10, %v471_v5, %v470_v37  ;;  %v515_v50 = vsub.s32 0, %v514_v18  ;;  %vm1557_vm13 = vmand %vm537_vm7, %vm531_vm6 }
 0x195   : > { %vm528_vm15 = vcmp.ne.s32.totalorder %v1504_v7, 0  ;;  %vm534_vm0 = vcmp.lt.s32.totalorder %v1504_v7, 0  ;;  %v546_v2 = vadd.s32 3, %v1504_v7  ;;  %v555_v34 = vsel %vm1557_vm13, %v1562_v16, %v1516_v54 }
 0x196   : > { %846 = vadd.xlane.f32.xlu0 %v845_v48  ;;  %v482_v42 = vsub.s32 0, %v481_v14  ;;  %v525_v48 = vsub.s32 %v985_v19, %v524_v41  ;;  %v1522_v59 = vsel %vm506_vm14, %v515_v50, %v514_v18  ;;  %vm1535_vm8 = vmand %vm534_vm0, %vm528_vm15 }
 0x197   : > { %vm532_vm9 = vcmp.ne.s32.totalorder %v1522_v59, 0  ;;  %vm538_vm10 = vcmp.lt.s32.totalorder %v1522_v59, 0  ;;  %v1565_v17 = vadd.s32 3, %v1522_v59  ;;  %v552_v25 = vsel %vm1535_vm8, %v546_v2, %v1504_v7 }
 0x198   : > { %v1510_v8 = vsel %vm473_vm11, %v482_v42, %v481_v14  ;;  %v526_v55 = vsub.s32 0, %v525_v48  ;;  %vm1576_vm0 = vmand %vm538_vm10, %vm532_vm9  ;;  %vm1618_vm7 = vcmp.eq.s32.totalorder %v552_v25, 0 }
 0x199   : > { %vm529_vm2 = vcmp.ne.s32.totalorder %v1510_v8, 0  ;;  %vm535_vm3 = vcmp.lt.s32.totalorder %v1510_v8, 0  ;;  %v547_v10 = vadd.s32 3, %v1510_v8  ;;  %v556_v6 = vsel %vm1576_vm0, %v1565_v17, %v1522_v59 }
 0x19a   : > { %v1539_v0 = vsel %vm517_vm1, %v526_v55, %v525_v48  ;;  %vm1543_vm11 = vmand %vm535_vm3, %vm529_vm2  ;;  %vm1845_vm3 = vcmp.lt.s32.totalorder %v1443_v20, 60 }
 0x19b   : > { %vm533_vm14 = vcmp.ne.s32.totalorder %v1539_v0, 0  ;;  %vm539_vm15 = vcmp.lt.s32.totalorder %v1539_v0, 0  ;;  %v1586_v28 = vadd.s32 3, %v1539_v0  ;;  %v553_v29 = vsel %vm1543_vm11, %v547_v10, %v1510_v8 }
 0x19c   : > { %vm1598_vm2 = vmand %vm539_vm15, %vm533_vm14  ;;  %vm1629_vm10 = vcmp.eq.s32.totalorder %v553_v29, 0  ;;  %vm1846_vm11 = vcmp.lt.s32.totalorder %v1445_v23, 60 }
 0x19d   : > { %v557_v5 = vsel %vm1598_vm2, %v1586_v28, %v1539_v0 }
 0x1a7   : > { %v1487_v4 = vpop.xlane.xlu0 %301 }
 0x1a8   : > { %1102 = vrsqrt.f32 %v1487_v4  ;;  %vm324_vm6 = vcmp.eq.f32.partialorder %v1487_v4, inf  ;;  %vm326_vm9 = vcmp.eq.f32.partialorder %v1487_v4, 0.0  ;;  %v327_v42 = vand.u32 2147483648, %v1487_v4 }
 0x1ab   : > { %v1493_v36 = vpop.xlane.xlu0 %304 }
 0x1ac   : > { %vm331_vm12 = vcmp.eq.f32.partialorder %v1493_v36, inf  ;;  %vm333_vm13 = vcmp.eq.f32.partialorder %v1493_v36, 0.0  ;;  %v334_v55 = vand.u32 2147483648, %v1493_v36 }
 0x1af   : > { %v1500_v43 = vpop.xlane.xlu0 %307 }
 0x1b0   : > { %v341_v3 = vand.u32 2147483648, %v1500_v43 }
 0x1b3   : > { %v1520_v58 = vpop.xlane.xlu0 %310 }
 0x1b4   : > { %vm347_vm14 = vcmp.eq.f32.partialorder %v1520_v58, 0.0 }
 0x1b5   : > { %v1103_v19 = vpop.eup %1102 }
 0x1b6   : > { %v323_v38 = vmul.f32 %v1103_v19, %v1487_v4 }
 0x1b7   : > { %v1495_v15 = vpop.xlane.xlu1 %298  ;;  %v1568_v21 = vpop.xlane.xlu0 %385 }
 0x1b8   : > { %1104 = vrsqrt.f32 %v1495_v15  ;;  %vm317_vm1 = vcmp.eq.f32.partialorder %v1495_v15, inf  ;;  %v320_v31 = vand.u32 2147483648, %v1495_v15  ;;  %vm319_vm4 = vcmp.eq.f32.partialorder %v1495_v15, 0.0 }
 0x1b9   : > { %1106 = vrsqrt.f32 %v1493_v36  ;;  %v325_v7 = vsel %vm324_vm6, %v1487_v4, %v323_v38  ;;  %vm567_vm6 = vcmp.lt.s32.totalorder %v1449_v51, 60 }
 0x1bb   : > { %v1507_v26 = vpop.xlane.xlu1 %370 }
 0x1bc   : > { %1108 = vrsqrt.f32 %v1507_v26  ;;  %vm389_vm5 = vcmp.eq.f32.partialorder %v1507_v26, inf  ;;  %v392_v39 = vand.u32 2147483648, %v1507_v26  ;;  %vm391_vm8 = vcmp.eq.f32.partialorder %v1507_v26, 0.0 }
 0x1bd   : > { %1110 = vrsqrt.f32 %v1500_v43 }
 0x1bf   : > { %v1527_v60 = vpop.xlane.xlu1 %373 }
 0x1c0   : > { %1112 = vrsqrt.f32 %v1527_v60  ;;  %vm396_vm15 = vcmp.eq.f32.partialorder %v1527_v60, inf  ;;  %v399_v54 = vand.u32 2147483648, %v1527_v60 }
 0x1c1   : > { %1114 = vrsqrt.f32 %v1520_v58 }
 0x1c3   : > { %v1554_v12 = vpop.xlane.xlu1 %376 }
 0x1c4   : > { %1116 = vrsqrt.f32 %v1554_v12  ;;  %v406_v25 = vand.u32 2147483648, %v1554_v12 }
 0x1c5   : > { %v1105_v24 = vpop.eup %1104  ;;  %1118 = vrsqrt.f32 %v1568_v21 }
 0x1c6   : > { %v316_v27 = vmul.f32 %v1105_v24, %v1495_v15  ;;  %v1107_v35 = vpop.eup %1106 }
 0x1c7   : > { %v1595_v32 = vpop.xlane.xlu1 %379  ;;  %v330_v50 = vmul.f32 %v1107_v35, %v1493_v36 }
 0x1c8   : > { %v318_v37 = vsel %vm317_vm1, %v1495_v15, %v316_v27  ;;  %1120 = vrsqrt.f32 %v1595_v32  ;;  %vm398_vm1 = vcmp.eq.f32.partialorder %v1527_v60, 0.0 }
 0x1c9   : > { %v1109_v14 = vpop.eup %1108  ;;  %v321_v15 = vsel %vm319_vm4, %v320_v31, %v318_v37  ;;  %vm338_vm4 = vcmp.eq.f32.partialorder %v1500_v43, inf  ;;  %v332_v16 = vsel %vm331_vm12, %v1493_v36, %v330_v50  ;;  %vm1678_vm12 = vcmp.eq.s32.totalorder %v555_v34, 0 }
 0x1ca   : > { %v388_v41 = vmul.f32 %v1109_v14, %v1507_v26  ;;  %v1111_v45 = vpop.eup %1110  ;;  %v335_v38 = vsel %vm333_vm13, %v334_v55, %v332_v16  ;;  %vm571_vm13 = vmand %vm1629_vm10, %vm1846_vm11 }
 0x1cb   : > { %v1637_v44 = vpop.xlane.xlu1 %382  ;;  %v337_v19 = vmul.f32 %v1111_v45, %v1500_v43 }
 0x1cc   : > { %v390_v48 = vsel %vm389_vm5, %v1507_v26, %v388_v41  ;;  %1122 = vrsqrt.f32 %v1637_v44  ;;  %vm1653_vm5 = vcmp.eq.s32.totalorder %v554_v30, 0  ;;  %v328_v26 = vsel %vm326_vm9, %v327_v42, %v325_v7 }
 0x1cd   : > { %v1113_v8 = vpop.eup %1112  ;;  %v393_v9 = vsel %vm391_vm8, %v392_v39, %v390_v48  ;;  %vm340_vm8 = vcmp.eq.f32.partialorder %v1500_v43, 0.0  ;;  %vm403_vm9 = vcmp.eq.f32.partialorder %v1554_v12, inf  ;;  %v348_v30 = vand.u32 2147483648, %v1520_v58 }
 0x1ce   : > { %v395_v61 = vmul.f32 %v1113_v8, %v1527_v60  ;;  %v429_v1 = vsub.f32 %v321_v15, %v393_v9  ;;  %v1115_v11 = vpop.eup %1114  ;;  %v339_v41 = vsel %vm338_vm4, %v1500_v43, %v337_v19  ;;  %v413_v42 = vand.u32 2147483648, %v1595_v32 }
 0x1cf   : > { %v1663_v10 = vpop.xlane.xlu1 %313  ;;  %v344_v37 = vmul.f32 %v1115_v11, %v1520_v58  ;;  %vm412_vm4 = vcmp.eq.f32.partialorder %v1595_v32, 0.0  ;;  %v342_v8 = vsel %vm340_vm8, %v341_v3, %v339_v41  ;;  %vm417_vm0 = vcmp.eq.f32.partialorder %v1637_v44, inf }
 0x1d0   : > { %v397_v13 = vsel %vm396_vm15, %v1527_v60, %v395_v61  ;;  %1124 = vrsqrt.f32 %v1663_v10  ;;  %v435_v27 = vadd.f32 0.2, %v429_v1  ;;  %vm405_vm15 = vcmp.eq.f32.partialorder %v1554_v12, 0.0 }
 0x1d1   : > { %v1117_v4 = vpop.eup %1116  ;;  %v400_v24 = vsel %vm398_vm1, %v399_v54, %v397_v13  ;;  %vm1687_vm1 = vmand %vm1618_vm7, %vm1845_vm3  ;;  %vm424_vm7 = vcmp.eq.f32.partialorder %v1568_v21, inf  ;;  %vm410_vm3 = vcmp.eq.f32.partialorder %v1595_v32, inf  ;;  %v420_v55 = vand.u32 2147483648, %v1637_v44 }
 0x1d2   : > { %v402_v29 = vmul.f32 %v1117_v4, %v1554_v12  ;;  %v430_v31 = vsub.f32 %v328_v26, %v400_v24  ;;  %v441_v34 = vmax.f32 %v435_v27, 0.0  ;;  %v1119_v14 = vpop.eup %1118  ;;  %vm419_vm11 = vcmp.eq.f32.partialorder %v1637_v44, 0.0 }
 0x1d3   : > { %v423_v18 = vmul.f32 %v1119_v14, %v1568_v21  ;;  %vm1875_vm8 = vcmp.lt.s32.totalorder %v1447_v49, 60  ;;  %v427_v11 = vand.u32 2147483648, %v1568_v21 }
 0x1d4   : > { %v404_v39 = vsel %vm403_vm9, %v1554_v12, %v402_v29  ;;  %v436_v40 = vadd.f32 0.2, %v430_v31  ;;  %v576_v45 = vsel %vm1687_vm1, %v441_v34, 0.0  ;;  %vm1717_vm9 = vcmp.eq.s32.totalorder %v556_v6, 0  ;;  %vm572_vm10 = vmand %vm1653_vm5, %vm1875_vm8 }
 0x1d5   : > { %v1121_v15 = vpop.eup %1120  ;;  %v407_v36 = vsel %vm405_vm15, %v406_v25, %v404_v39  ;;  %vm1873_vm15 = vcmp.eq.f32.partialorder %v1520_v58, inf  ;;  %vm1874_vm1 = vcmask 7168   ;;  %v425_v16 = vsel %vm424_vm7, %v1568_v21, %v423_v18 }
 0x1d6   : > { %v409_v48 = vmul.f32 %v1121_v15, %v1595_v32  ;;  %v431_v7 = vsub.f32 %v335_v38, %v407_v36  ;;  %v442_v50 = vmax.f32 %v436_v40, 0.0  ;;  %v346_v9 = vsel %vm1873_vm15, %v1520_v58, %v344_v37  ;;  %vm1876_vm15 = vmmov %vm1874_vm1 }
 0x1d7   : > { %v583_v22 = vsel %vm1874_vm1, %v576_v45, 0.0  ;;  %v349_v13 = vsel %vm347_vm14, %v348_v30, %v346_v9  ;;  %vm352_vm5 = vcmp.eq.f32.partialorder %v1663_v10, inf  ;;  %v355_v25 = vand.u32 2147483648, %v1663_v10  ;;  %vm573_vm14 = vmand %vm1678_vm12, %vm567_vm6 }
 0x1d8   : > { %v411_v54 = vsel %vm410_vm3, %v1595_v32, %v409_v48  ;;  %v437_v59 = vadd.f32 0.2, %v431_v7  ;;  %v577_v17 = vsel %vm571_vm13, %v442_v50, 0.0  ;;  %vm426_vm3 = vcmp.eq.f32.partialorder %v1568_v21, 0.0  ;;  %vm1877_vm7 = vmmov %vm1874_vm1 }
 0x1d9   : > { %v1123_v6 = vpop.eup %1122  ;;  %v414_v61 = vsel %vm412_vm4, %v413_v42, %v411_v54  ;;  %v584_v43 = vsel %vm1876_vm15, %v577_v17, 0.0  ;;  %vm354_vm13 = vcmp.eq.f32.partialorder %v1663_v10, 0.0  ;;  %v428_v60 = vsel %vm426_vm3, %v427_v11, %v425_v16  ;;  %vm1880_vm8 = vmmov %vm1877_vm7 }
 0x1da   : > { %v416_v1 = vmul.f32 %v1123_v6, %v1637_v44  ;;  %v432_v32 = vsub.f32 %v342_v8, %v414_v61  ;;  %v443_v26 = vmax.f32 %v437_v59, 0.0  ;;  %v585_v3 = vadd.f32 %v584_v43, %v583_v22  ;;  %vm1881_vm2 = vmmov %vm1877_vm7 }
 0x1db   : > { %vm1878_vm12 = vcmp.lt.s32.totalorder %v1451_v52, 60  ;;  %vm1883_vm15 = vcmp.lt.s32.totalorder %v1443_v20, 60  ;;  %vm1884_vm3 = vmmov %vm1881_vm2 }
 0x1dc   : > { %v418_v2 = vsel %vm417_vm0, %v1637_v44, %v416_v1  ;;  %v438_v19 = vadd.f32 0.2, %v432_v32  ;;  %v578_v4 = vsel %vm572_vm10, %v443_v26, 0.0  ;;  %vm574_vm4 = vmand %vm1717_vm9, %vm1878_vm12  ;;  %vm1882_vm9 = vcmp.lt.s32.totalorder %v1445_v23, 60 }
 0x1dd   : > { %v1125_v24 = vpop.eup %1124  ;;  %v421_v58 = vsel %vm419_vm11, %v420_v55, %v418_v2  ;;  %v586_v21 = vsel %vm1877_vm7, %v578_v4, 0.0  ;;  %vm563_vm11 = vcmp.eq.s32.totalorder %v557_v5, 0  ;;  %vm1879_vm10 = vmmov %vm1874_vm1  ;;  %vm569_vm1 = vcmp.lt.s32.totalorder %v1456_v53, 60 }
 0x1de   : > { %v351_v27 = vmul.f32 %v1125_v24, %v1663_v10  ;;  %v433_v29 = vsub.f32 %v349_v13, %v421_v58  ;;  %v444_v30 = vmax.f32 %v438_v19, 0.0  ;;  %v587_v31 = vadd.f32 %v586_v21, %v585_v3  ;;  %vm575_vm0 = vmand %vm563_vm11, %vm569_vm1 }
 0x1df   : > { %vm1888_vm7 = vmmov %vm1881_vm2 }
 0x1e0   : > { %v353_v37 = vsel %vm352_vm5, %v1663_v10, %v351_v27  ;;  %v439_v38 = vadd.f32 0.2, %v433_v29  ;;  %v579_v34 = vsel %vm573_vm14, %v444_v30, 0.0  ;;  %vm1885_vm5 = vmmov %vm1881_vm2 }
 0x1e1   : > { %v356_v14 = vsel %vm354_vm13, %v355_v25, %v353_v37  ;;  %v588_v44 = vsel %vm1879_vm10, %v579_v34, 0.0  ;;  %vm1886_vm13 = vcmp.lt.s32.totalorder %v1447_v49, 60  ;;  %vm1887_vm14 = vmmov %vm1881_vm2 }
 0x1e2   : > { %v434_v35 = vsub.f32 %v356_v14, %v428_v60  ;;  %v445_v39 = vmax.f32 %v439_v38, 0.0  ;;  %v589_v10 = vadd.f32 %v588_v44, %v587_v31  ;;  %vm1890_vm11 = vmmov %vm1881_vm2 }
 0x1e4   : > { %v440_v41 = vadd.f32 0.2, %v434_v35  ;;  %v580_v40 = vsel %vm574_vm4, %v445_v39, 0.0 }
 0x1e5   : > { %v590_v0 = vsel %vm1880_vm8, %v580_v40, 0.0 }
 0x1e6   : > { %v446_v28 = vmax.f32 %v440_v41, 0.0  ;;  %v591_v33 = vadd.f32 %v590_v0, %v589_v10 }
 0x1e8   : > { %v581_v5 = vsel %vm575_vm0, %v446_v28, 0.0 }
 0x1e9   : > { %v592_v15 = vsel %vm1881_vm2, %v581_v5, 0.0 }
 0x1ea   : > { %v593_v42 = vadd.f32 %v592_v15, %v591_v33 }
 0x1ec   : > { %594 = vadd.xlane.f32.xlu0 %v593_v42 }
 0x207   : > { %v764_v36 = vpop.xlane.xlu1 %763 }
 0x208   : > { %1126 = vlog2.f32 %v764_v36 }
 0x20b   : > { %v761_v45 = vpop.xlane.xlu0 %760  ;;  %v770_v48 = vpop.xlane.xlu1 %769 }
 0x20c   : > { %1128 = vlog2.f32 %v761_v45 }
 0x20d   : > { %1130 = vlog2.f32 %v770_v48 }
 0x20f   : > { %v767_v7 = vpop.xlane.xlu0 %766  ;;  %v776_v50 = vpop.xlane.xlu1 %775 }
 0x210   : > { %1132 = vlog2.f32 %v767_v7 }
 0x211   : > { %1134 = vlog2.f32 %v776_v50 }
 0x213   : > { %v773_v12 = vpop.xlane.xlu0 %772  ;;  %v838_v9 = vpop.xlane.xlu1 %837 }
 0x214   : > { %1136 = vlog2.f32 %v773_v12 }
 0x215   : > { %v1127_v18 = vpop.eup %1126 }
 0x216   : > { %v780_v8 = vmul.f32 0.6931472, %v1127_v18 }
 0x217   : > { %v835_v59 = vpop.xlane.xlu0 %834  ;;  %v844_v26 = vpop.xlane.xlu1 %843 }
 0x218   : > { %v790_v22 = vadd.f32 %v780_v8, %v1402_v47 }
 0x219   : > { %v1129_v54 = vpop.eup %1128 }
 0x21a   : > { %v1131_v17 = vpop.eup %1130  ;;  %v778_v6 = vmul.f32 0.6931472, %v1129_v54  ;;  %v852_v61 = vsub.f32 %v790_v22, %v838_v9 }
 0x21b   : > { %v784_v55 = vmul.f32 0.6931472, %v1131_v17  ;;  %v841_v19 = vpop.xlane.xlu0 %840  ;;  %v850_v30 = vpop.xlane.xlu1 %849 }
 0x21c   : > { %v789_v43 = vadd.f32 %v778_v6, %v1410_v57  ;;  %v858_v47 = vsel %vm1882_vm9, %v852_v61, 0.0 }
 0x21d   : > { %v1133_v1 = vpop.eup %1132  ;;  %v792_v32 = vadd.f32 %v784_v55, %v1400_v46  ;;  %v864_v27 = vsel %vm1885_vm5, %v858_v47, 0.0 }
 0x21e   : > { %v1135_v3 = vpop.eup %1134  ;;  %v782_v11 = vmul.f32 0.6931472, %v1133_v1  ;;  %v851_v13 = vsub.f32 %v789_v43, %v835_v59 }
 0x21f   : > { %v788_v16 = vmul.f32 0.6931472, %v1135_v3  ;;  %v854_v2 = vsub.f32 %v792_v32, %v844_v26  ;;  %v847_v37 = vpop.xlane.xlu0 %846 }
 0x220   : > { %v857_v4 = vsel %vm1883_vm15, %v851_v13, 0.0  ;;  %v791_v24 = vadd.f32 %v782_v11, %v1408_v56 }
 0x221   : > { %v1137_v25 = vpop.eup %1136  ;;  %v863_v57 = vsel %vm1884_vm3, %v857_v4, 0.0  ;;  %v794_v46 = vadd.f32 %v788_v16, %v1416_v62  ;;  %v860_v29 = vsel %vm567_vm6, %v854_v2, 0.0  ;;  %vm1889_vm6 = vmmov %vm1878_vm12 }
 0x222   : > { %v786_v58 = vmul.f32 0.6931472, %v1137_v25  ;;  %v853_v21 = vsub.f32 %v791_v24, %v841_v19  ;;  %v865_v23 = vadd.f32 %v864_v27, %v863_v57  ;;  %v868_v34 = vsel %vm1888_vm7, %v860_v29, 0.0  ;;  %vm1891_vm12 = vmmov %vm1881_vm2 }
 0x223   : > { %v856_v31 = vsub.f32 %v794_v46, %v850_v30 }
 0x224   : > { %v859_v20 = vsel %vm1886_vm13, %v853_v21, 0.0  ;;  %v793_v56 = vadd.f32 %v786_v58, %v1418_v63 }
 0x225   : > { %v866_v60 = vsel %vm1887_vm14, %v859_v20, 0.0  ;;  %v862_v14 = vsel %vm569_vm1, %v856_v31, 0.0 }
 0x226   : > { %v867_v38 = vadd.f32 %v866_v60, %v865_v23  ;;  %v855_v62 = vsub.f32 %v793_v56, %v847_v37  ;;  %v872_v39 = vsel %vm1891_vm12, %v862_v14, 0.0 }
 0x228   : > { %v861_v51 = vsel %vm1889_vm6, %v855_v62, 0.0  ;;  %v869_v44 = vadd.f32 %v868_v34, %v867_v38 }
 0x229   : > { %v870_v49 = vsel %vm1890_vm11, %v861_v51, 0.0 }
 0x22a   : > { %v871_v35 = vadd.f32 %v870_v49, %v869_v44 }
 0x22c   : > { %v873_v63 = vadd.f32 %v872_v39, %v871_v35 }
 0x22e   : > { %874 = vadd.xlane.f32.xlu1 %v873_v63 }
 0x275   : > { %v595_v10 = vpop.xlane.xlu0 %594 }
 0x276   : > { %v596_v41 = vrot.slane %v595_v10, 4 }
 0x278   : > { %v597_v40 = vadd.f32 %v596_v41, %v595_v10 }
 0x27a   : > { %v598_v0 = vrot.slane %v597_v40, 2 }
 0x27c   : > { %v599_v28 = vadd.f32 %v598_v0, %v597_v40 }
 0x27e   : > { %v600_v33 = vrot.slane %v599_v28, 1 }
 0x280   : > { %v601_v53 = vadd.f32 %v600_v33, %v599_v28 }
 0x282   : > { %1044 = vpush %v601_v53 }
 0x2b3   : > { %s1045_s5 = spop %1044 }
 0x2b4   : > { %s603_s8 = smul.f32 0.05, %s1045_s5 }
 0x2b7   : > { %v875_v52 = vpop.xlane.xlu1 %874 }
 0x2b8   : > { %v876_v5 = vrot.slane %v875_v52, 4 }
 0x2ba   : > { %v877_v15 = vadd.f32 %v876_v5, %v875_v52 }
 0x2bc   : > { %v878_v42 = vrot.slane %v877_v15, 2 }
 0x2be   : > { %v879_v36 = vadd.f32 %v878_v42, %v877_v15 }
 0x2c0   : > { %v880_v45 = vrot.slane %v879_v36, 1 }
 0x2c2   : > { %v881_v48 = vadd.f32 %v880_v45, %v879_v36 }
 0x2c4   : > { %1046 = vpush %v881_v48 }
 0x2f5   : > { %s1047_s6 = spop %1046 }
 0x2f6   : > { %s883_s7 = smul.f32 0.016666668, %s1047_s6 }
 0x2f8   : > { %s884_s10 = smul.f32 30.0, %s883_s7 }
 0x2fa   : > { %s885_s13 = sadd.f32 %s884_s10, %s603_s8 }
 0x2fc   : > { %v886_v7 = vstv %s885_s13 }
 0x2fd   : > { %887 = vst [vmem:[%s207_s11] sm:$0xff] %v886_v7 }
 0x2fe   : > { %1151 = shalt.err (!%p1148_p3)
}
 0x2ff   : > { %s1152_s5 = scalar_lea.hbm %s1805_s22, 128  ;;  %s1156_s7 = scalar_lea.hbm %s1844_s4, 256 }
 0x300   : > { %p1153_p4 = scmp.ne.s32.totalorder %s1805_s22, %s1152_s5  ;;  %p1157_p9 = scmp.lt.s32.totalorder %s1805_s22, %s1844_s4 }
 0x301   : > { %p1158_p10 = scmp.lt.s32.totalorder %s1156_s7, %s1152_s5 }
 0x302   : > { %p1154_p7 = pnand %p1153_p4, %p1265_p5 }
 0x303   : > { %p1159_p11 = por %p1158_p10, %p1157_p9 }
 0x304   : > { %p1155_p8 = pneg %p1154_p7 }
 0x306   : > { %p1160_p12 = pnand %p1159_p11, %p1155_p8 }
 0x308   : > { %1163 = shalt.err (!%p1160_p12)
}
 0x309   : > { %1048 = dma.vmem_to_hbm [thread:$0]  (%p1265_p5), %s903_s12, 128, %s1805_s22, %s889_s23  }
 0x30a PF: > { %p1054_p13 = scmp.ge.s32.totalorder %s1198_s18, 2  ;;  %s914_s10 = sand.u32 1, %s1186_s15  }
 0x30b   : > { %s915_s11 = scalar_lea.sflag [#allocation3], %s914_s10 }
 0x30c   : > { %p1051_p0 = pnand %p1054_p13, %p1269_p6 }
 0x30e   : > { %p1052_p1 = pneg %p1051_p0 }
 0x310   : > { %1181 = dma.done.wait (%p1052_p1), %s915_s11, 128  }
 0x311   : > { %1183 = vsyncadd (%p1052_p1), %s915_s11, 4294967168  ;;  %p14_p2 = scmp.ge.s32.totalorder %s1252_s21, 4   ;;  %s1892_s15 = smov %s1190_s16 }
 0x312   : > { %s1893_s16 = smov %s1194_s17  ;;  %s1894_s17 = smov %s1263_s24 }
 0x313   : > { %s1895_s18 = smov %s1252_s21  ;;  %16 = sbr.rel (!%p14_p2) target bundleno = 3 (0x3), region = 74 }
 0x318   :  { %920 = vsyncpa [#allocation3], 1 }
 0x319   :  { %922 = vsyncpa [#allocation3 + $0x1], 1 }

</bundles_post_ra>
